<compile_context>
chip_gen: v7x
topology: tpu7x:2x2x1
jax: 0.10.0
libtpu: 0.0.40
codegen_flags: <defaults>
</compile_context>

<pallas_src>
import math
import functools

import jax
import jax.numpy as jnp
from jax import lax
from jax.experimental import pallas as pl
from jax.experimental.pallas import tpu as pltpu


# ----------------------------------------------------------------------------
# Stage 1: projection kernel (y = x @ W + b), tiled over (batch, seq).
# ----------------------------------------------------------------------------
def _proj_kernel(x_ref, w_ref, b_ref, o_ref):
    # x: (1, TL, Ein)  w: (Ein, Eout)  b: (1, Eout) f32  o: (1, TL, Eout)
    o_ref[0] = (jnp.dot(x_ref[0], w_ref[...],
                        preferred_element_type=jnp.float32)
                + b_ref[0]).astype(o_ref.dtype)


def _project(x, w, b, *, tile_l, out_dtype, vmem_limit):
    Bx, L, Ein = x.shape
    Eout = w.shape[1]
    return pl.pallas_call(
        _proj_kernel,
        out_shape=jax.ShapeDtypeStruct((Bx, L, Eout), out_dtype),
        grid_spec=pltpu.PrefetchScalarGridSpec(
            num_scalar_prefetch=0,
            grid=(Bx, L // tile_l),
            in_specs=[
                pl.BlockSpec((1, tile_l, Ein), lambda b, l: (b, l, 0)),
                pl.BlockSpec((Ein, Eout), lambda b, l: (0, 0)),
                pl.BlockSpec((1, Eout), lambda b, l: (0, 0)),
            ],
            out_specs=pl.BlockSpec((1, tile_l, Eout), lambda b, l: (b, l, 0)),
        ),
        compiler_params=pltpu.CompilerParams(
            dimension_semantics=("parallel", "parallel"),
            vmem_limit_bytes=vmem_limit),
    )(x, w, b)


# ----------------------------------------------------------------------------
# Stage 2: flash attention with online softmax over Lk chunks.
# ----------------------------------------------------------------------------
def _flash_kernel(q_ref, kv_ref, o_ref, qh_sc, m_sc, l_sc, acc_sc, *,
                  nhead, head_size, emsize, tk, lk_valid, approx_recip):
    # q_ref:  (1, TQ, E)   projected Q (scale already folded in), compute dtype
    # kv_ref: (1, TK, 2E)  projected [K | V], compute dtype
    # o_ref:  (1, TQ, E)
    # qh_sc:  (H, TQ, hs) compute dtype   m/l: (H, TQ, 1) f32   acc: (H, TQ, hs) f32
    ki = pl.program_id(2)
    nk = pl.num_programs(2)

    @pl.when(ki == 0)
    def _init():
        m_sc[...] = jnp.full(m_sc.shape, -jnp.inf, jnp.float32)
        l_sc[...] = jnp.zeros(l_sc.shape, jnp.float32)
        acc_sc[...] = jnp.zeros(acc_sc.shape, jnp.float32)
        # Head split once per (b, q-tile): single reshape + swapaxes.
        q = q_ref[0]                                            # (TQ, E)
        qh_sc[...] = jnp.swapaxes(
            q.reshape(q.shape[0], nhead, head_size), 0, 1)      # (H, TQ, hs)

    kv = kv_ref[0]                                              # (TK, 2E)
    kh = jnp.swapaxes(kv[:, :emsize].reshape(tk, nhead, head_size), 0, 1)
    vh = jnp.swapaxes(kv[:, emsize:].reshape(tk, nhead, head_size), 0, 1)
    qh = qh_sc[...]

    # Scores: head-batched NT matmul with f32 accumulation (no transpose
    # materialized; no score-tensor rescale — folded into Wq/bq).
    s = jnp.einsum('hqd,hkd->hqk', qh, kh,
                   preferred_element_type=jnp.float32)          # (H, TQ, TK)

    if lk_valid is not None:   # compiled in only when Lk was padded
        key_pos = ki * tk + lax.broadcasted_iota(jnp.int32, s.shape, 2)
        s = jnp.where(key_pos < lk_valid, s, -1e9)

    # Online softmax update (stats in f32, exactly one exp pass over scores).
    m_prev = m_sc[...]
    m_new = jnp.maximum(m_prev, jnp.max(s, axis=-1, keepdims=True))
    alpha = jnp.exp(m_prev - m_new)
    p = jnp.exp(s - m_new)
    l_sc[...] = alpha * l_sc[...] + jnp.sum(p, axis=-1, keepdims=True)
    acc_sc[...] = alpha * acc_sc[...] + jnp.einsum(
        'hqk,hkd->hqd', p.astype(vh.dtype), vh,
        preferred_element_type=jnp.float32)
    m_sc[...] = m_new

    @pl.when(ki == nk - 1)
    def _finalize():
        # Normalize AFTER the PV matmul (H*TQ*hs multiplies, not H*TQ*Lk).
        inv_l = pl.reciprocal(l_sc[...], approx=approx_recip)   # EUP slot
        ctx = acc_sc[...] * inv_l                               # (H, TQ, hs)
        out = jnp.swapaxes(ctx, 0, 1).reshape(ctx.shape[1], nhead * head_size)
        o_ref[0] = out.astype(o_ref.dtype)                      # one lane-dense store


# ----------------------------------------------------------------------------
# Wrapper
# ----------------------------------------------------------------------------
def _round_up(x, m):
    return (x + m - 1) // m * m


def _tile_defaults():
    """Returns (block_q, block_k, vmem_limit_bytes), TPU-generation aware."""
    vmem_bytes = 128 * 1024 * 1024
    try:
        vmem_bytes = int(getattr(pltpu.get_tpu_info(), "vmem_capacity_bytes",
                                 vmem_bytes))
    except Exception:
        pass
    if vmem_bytes <= 64 * 1024 * 1024:            # v7x-class: 64 MiB VMEM / TC
        return 128, 512, 38 * 1024 * 1024
    return 256, 512, 64 * 1024 * 1024             # v5e / v6e: 128 MiB VMEM


def multihead_attention(query_em, key_value_em, params, *, nhead,
                        compute_dtype=jnp.bfloat16, approx_recip=True,
                        block_q=None, block_k=None):
    """query_em: [B, Lq, E], key_value_em: [B, Lk, E]. Returns [B, Lq, E]."""
    B, Lq, E = query_em.shape
    Bk, Lk, Ek = key_value_em.shape
    assert Bk == B and Ek == E
    hs = E // nhead
    assert hs * nhead == E, "embed_dim must be divisible by num_heads"

    dq, dk, vmem_limit = _tile_defaults()
    block_q = dq if block_q is None else block_q
    block_k = dk if block_k is None else block_k

    tq = min(block_q, _round_up(Lq, 8))
    tk = min(block_k, _round_up(Lk, 8))
    Lq_pad = _round_up(Lq, tq)
    Lk_pad = _round_up(Lk, tk)
    # Expose >=2 independent grid steps (v7x has two TensorCores).
    if B == 1 and Lq_pad == tq and tq % 16 == 0:
        tq //= 2

    out_dtype = query_em.dtype
    scale = 1.0 / math.sqrt(hs)

    # Fold softmax scale into the Q projection; fuse K|V into one matmul.
    wq = (params["wq"] * scale).astype(compute_dtype)
    bq = (params["bq"] * scale).reshape(1, E).astype(jnp.float32)
    wkv = jnp.concatenate([params["wk"], params["wv"]], axis=1).astype(compute_dtype)
    bkv = jnp.concatenate([params["bk"], params["bv"]]).reshape(1, 2 * E).astype(jnp.float32)

    q_in = query_em.astype(compute_dtype)
    kv_in = key_value_em.astype(compute_dtype)
    if Lq_pad != Lq:
        q_in = jnp.pad(q_in, ((0, 0), (0, Lq_pad - Lq), (0, 0)))
    if Lk_pad != Lk:
        kv_in = jnp.pad(kv_in, ((0, 0), (0, Lk_pad - Lk), (0, 0)))

    # Stage 1: projections (hoisted out of the attention grid).
    q_proj = _project(q_in, wq, bq, tile_l=tq, out_dtype=compute_dtype,
                      vmem_limit=vmem_limit)
    kv_proj = _project(kv_in, wkv, bkv, tile_l=tk, out_dtype=compute_dtype,
                       vmem_limit=vmem_limit)

    # Stage 2: flash attention over (batch, q-tiles, k-tiles).
    kernel = functools.partial(
        _flash_kernel, nhead=nhead, head_size=hs, emsize=E, tk=tk,
        lk_valid=(Lk if Lk_pad != Lk else None), approx_recip=approx_recip)

    out = pl.pallas_call(
        kernel,
        out_shape=jax.ShapeDtypeStruct((B, Lq_pad, E), out_dtype),
        grid_spec=pltpu.PrefetchScalarGridSpec(
            num_scalar_prefetch=0,
            grid=(B, Lq_pad // tq, Lk_pad // tk),
            in_specs=[
                pl.BlockSpec((1, tq, E), lambda b, qi, ki: (b, qi, 0)),       # Q
                pl.BlockSpec((1, tk, 2 * E), lambda b, qi, ki: (b, ki, 0)),   # K|V
            ],
            out_specs=pl.BlockSpec((1, tq, E), lambda b, qi, ki: (b, qi, 0)),
            scratch_shapes=[
                pltpu.VMEM((nhead, tq, hs), compute_dtype),   # cached Q heads
                pltpu.VMEM((nhead, tq, 1), jnp.float32),      # m (running max)
                pltpu.VMEM((nhead, tq, 1), jnp.float32),      # l (running denom)
                pltpu.VMEM((nhead, tq, hs), jnp.float32),     # acc
            ],
        ),
        compiler_params=pltpu.CompilerParams(
            dimension_semantics=("parallel", "parallel", "arbitrary"),
            vmem_limit_bytes=vmem_limit),
    )(q_proj, kv_proj)

    if Lq_pad != Lq:
        out = out[:, :Lq, :]
    return out


# ----------------------------------------------------------------------------
# Pure-JAX reference mirroring the PyTorch forward (mask=None).
# ----------------------------------------------------------------------------
def multihead_attention_ref(query_em, key_value_em, params, *, nhead):
    B, Lq, E = query_em.shape
    _, Lk, _ = key_value_em.shape
    hs = E // nhead
    Q = query_em @ params["wq"] + params["bq"]
    K = key_value_em @ params["wk"] + params["bk"]
    V = key_value_em @ params["wv"] + params["bv"]
    Qh = Q.reshape(B, Lq, nhead, hs).transpose(0, 2, 1, 3)
    Kh = K.reshape(B, Lk, nhead, hs).transpose(0, 2, 1, 3)
    Vh = V.reshape(B, Lk, nhead, hs).transpose(0, 2, 1, 3)
    scores = jnp.einsum("bhqd,bhkd->bhqk", Qh, Kh) / math.sqrt(hs)
    attn = jax.nn.softmax(scores, axis=-1)
    ctx = jnp.einsum("bhqk,bhkd->bhqd", attn, Vh)
    return ctx.transpose(0, 2, 1, 3).reshape(B, Lq, E)


if __name__ == "__main__":
    # Small deterministic problem: B=2, Lq=8, Lk=8, emsize=32, nhead=4.
    B, Lq, Lk, E, NHEAD = 2, 8, 8, 32, 4

    key = jax.random.PRNGKey(0)
    k_q, k_kv, k_wq, k_bq, k_wk, k_bk, k_wv, k_bv = jax.random.split(key, 8)

    query_em = jax.random.normal(k_q, (B, Lq, E), dtype=jnp.float32)
    key_value_em = jax.random.normal(k_kv, (B, Lk, E), dtype=jnp.float32)

    # nn.Linear-style init, stored as [in, out] (transposed from torch's [out, in]).
    bound = 1.0 / math.sqrt(E)
    params = {
        "wq": jax.random.uniform(k_wq, (E, E), jnp.float32, -bound, bound),
        "bq": jax.random.uniform(k_bq, (E,), jnp.float32, -bound, bound),
        "wk": jax.random.uniform(k_wk, (E, E), jnp.float32, -bound, bound),
        "bk": jax.random.uniform(k_bk, (E,), jnp.float32, -bound, bound),
        "wv": jax.random.uniform(k_wv, (E, E), jnp.float32, -bound, bound),
        "bv": jax.random.uniform(k_bv, (E,), jnp.float32, -bound, bound),
    }

    ref = multihead_attention_ref(query_em, key_value_em, params, nhead=NHEAD)

    # 1) Exact-math config (f32 matmuls, exact reciprocal): tight tolerance.
    out_f32 = multihead_attention(query_em, key_value_em, params, nhead=NHEAD,
                                  compute_dtype=jnp.float32, approx_recip=False)
    out_f32 = jax.block_until_ready(out_f32)
    assert out_f32.shape == (B, Lq, E)
    assert jnp.allclose(out_f32, ref, atol=1e-5, rtol=1e-5), "f32 mismatch vs reference"

    # 2) Performance config (bf16 MXU inputs, f32 accumulation/softmax stats,
    #    approx reciprocal): bf16-appropriate tolerance.
    out_bf16 = multihead_attention(query_em, key_value_em, params, nhead=NHEAD)
    out_bf16 = jax.block_until_ready(out_bf16)
    assert out_bf16.shape == (B, Lq, E)
    assert jnp.allclose(out_bf16, ref, atol=5e-2, rtol=5e-2), "bf16 mismatch vs reference"

    # 3) Ragged lengths (exercise Lq/Lk padding + in-kernel key masking).
    q_r = query_em[:, :5, :]
    kv_r = key_value_em[:, :7, :]
    ref_r = multihead_attention_ref(q_r, kv_r, params, nhead=NHEAD)
    out_r = multihead_attention(q_r, kv_r, params, nhead=NHEAD,
                                compute_dtype=jnp.float32, approx_recip=False)
    out_r = jax.block_until_ready(out_r)
    assert out_r.shape == (B, 5, E)
    assert jnp.allclose(out_r, ref_r, atol=1e-5, rtol=1e-5), "ragged mismatch vs reference"

    print("KERNEL_OK")
</pallas_src>

<mosaic_0001>
module attributes {stable_mosaic.version = 11 : i64} {
  func.func @_proj_kernel(%arg0: i32, %arg1: i32, %arg2: memref<1x8x32xf32, #tpu.memory_space<vmem>>, %arg3: memref<32x32xf32, #tpu.memory_space<vmem>>, %arg4: memref<1x32xf32, #tpu.memory_space<vmem>>, %arg5: memref<1x8x32xf32, #tpu.memory_space<vmem>>) attributes {dimension_semantics = [#tpu.dimension_semantics<parallel>, #tpu.dimension_semantics<parallel>], iteration_bounds = array<i64: 2, 1>, scalar_prefetch = 0 : i64, scratch_operands = 0 : i64, tpu.core_type = #tpu.core_type<tc>, window_params = [{transform_indices = @transform_0, window_bounds = array<i64: 1, 8, 32>}, {pipeline_mode = #tpu.pipeline_mode<synchronous>, transform_indices = @transform_1, window_bounds = array<i64: 32, 32>}, {pipeline_mode = #tpu.pipeline_mode<synchronous>, transform_indices = @transform_2, window_bounds = array<i64: 1, 32>}, {transform_indices = @transform_3, window_bounds = array<i64: 1, 8, 32>}]} {
    %c0 = arith.constant 0 : index
    %c0_0 = arith.constant 0 : index
    %c0_1 = arith.constant 0 : index
    %0 = vector.load %arg2[%c0, %c0_0, %c0_1] : memref<1x8x32xf32, #tpu.memory_space<vmem>>, vector<1x8x32xf32>
    %1 = vector.shape_cast %0 : vector<1x8x32xf32> to vector<8x32xf32>
    %c0_2 = arith.constant 0 : index
    %c0_3 = arith.constant 0 : index
    %2 = vector.load %arg3[%c0_2, %c0_3] : memref<32x32xf32, #tpu.memory_space<vmem>>, vector<32x32xf32>
    %cst = arith.constant dense<0.000000e+00> : vector<8x32xf32>
    %3 = tpu.matmul %1, %2, %cst {dimension_numbers = #tpu.dot_dimension_numbers<[1], [0], [0], [1], [0, 0, 1, 1], [], []>} : vector<8x32xf32>, vector<32x32xf32>, vector<8x32xf32> -> vector<8x32xf32>
    %c0_4 = arith.constant 0 : index
    %c0_5 = arith.constant 0 : index
    %4 = vector.load %arg4[%c0_4, %c0_5] : memref<1x32xf32, #tpu.memory_space<vmem>>, vector<1x32xf32>
    %5 = vector.shape_cast %4 : vector<1x32xf32> to vector<32xf32>
    %6 = vector.shape_cast %5 : vector<32xf32> to vector<1x32xf32>
    %7 = vector.broadcast %6 : vector<1x32xf32> to vector<8x32xf32>
    %8 = arith.addf %3, %7 : vector<8x32xf32>
    %c0_6 = arith.constant 0 : index
    %c0_7 = arith.constant 0 : index
    %c0_8 = arith.constant 0 : index
    %9 = vector.load %arg5[%c0_6, %c0_7, %c0_8] : memref<1x8x32xf32, #tpu.memory_space<vmem>>, vector<1x8x32xf32>
    %10 = vector.shape_cast %9 : vector<1x8x32xf32> to vector<8x32xf32>
    %11 = vector.shape_cast %8 : vector<8x32xf32> to vector<1x8x32xf32>
    tpu.vector_store %arg5[%c0_6, %c0_7, %c0_8], %11 {strides = array<i32>} : memref<1x8x32xf32, #tpu.memory_space<vmem>>, vector<1x8x32xf32>,
    return
  }
  func.func @transform_0(%arg0: i32, %arg1: i32) -> (i32, i32, i32) {
    %c0_i32 = arith.constant 0 : i32
    %c0_i32_0 = arith.constant 0 : i32
    return %arg0, %arg1, %c0_i32 : i32, i32, i32
  }
  func.func @transform_1(%arg0: i32, %arg1: i32) -> (i32, i32) {
    %c0_i32 = arith.constant 0 : i32
    %c0_i32_0 = arith.constant 0 : i32
    %c0_i32_1 = arith.constant 0 : i32
    return %c0_i32, %c0_i32_0 : i32, i32
  }
  func.func @transform_2(%arg0: i32, %arg1: i32) -> (i32, i32) {
    %c0_i32 = arith.constant 0 : i32
    %c0_i32_0 = arith.constant 0 : i32
    %c0_i32_1 = arith.constant 0 : i32
    return %c0_i32, %c0_i32_0 : i32, i32
  }
  func.func @transform_3(%arg0: i32, %arg1: i32) -> (i32, i32, i32) {
    %c0_i32 = arith.constant 0 : i32
    %c0_i32_0 = arith.constant 0 : i32
    return %arg0, %arg1, %c0_i32 : i32, i32, i32
  }
}

</mosaic_0001>

<bundles_post_ra>
// kernel: tpu_custom_call.1
= control target key start
LH: loop header
LB: loop body
LE: loop exit
PB: predicated region body
PF: predicated region fallthrough
CT: control target
= control target key end

     0   :  { %8 = vsyncpa [#allocation3], 0  ;;  %s1014_s0 = inlined_call_operand.hbm [shape: f32[2,8,32], index: 0, kind: input, shape index: {}]   ;;  %s1015_s1 = inlined_call_operand.hbm [shape: f32[32,32], index: 1, kind: input, shape index: {}]   ;;  %s1016_s2 = inlined_call_operand.hbm [shape: f32[1,32], index: 2, kind: input, shape index: {}]   ;;  %s1017_s3 = inlined_call_operand.hbm [shape: f32[2,8,32], index: 3, kind: output, shape index: {}]  }
   0x1   :  { %10 = vsyncpa [#allocation3 + $0x1], 0 }
   0x2   :  { %11 = vsyncpa [#allocation6], 0 }
   0x3   :  { %12 = vsyncpa [#allocation4], 0 }
   0x4   :  { %14 = vsyncpa [#allocation4 + $0x1], 0  ;;  %s763_s12 = smov 0   ;;  %s765_s13 = smov 0  }
   0x5   :  { %s767_s14 = smov 0   ;;  %s769_s15 = smov 0  }
   0x6   :  { %s771_s16 = smov 0   ;;  %s773_s17 = smov 0  }
   0x7 LB: > { %s431_s18 = sadd.s32 4294967295, %s732_s17   ;;  %s432_s19 = sadd.s32 4294967294, %s732_s17   ;;  %s732_s17 = sphi %s773_s17, %s20_s17   ;;  %s728_s16 = sphi %s771_s16, %s1039_s16   ;;  %s724_s15 = sphi %s769_s15, %s1038_s15   ;;  %s720_s14 = sphi %s767_s14, %s1037_s14   ;;  %s716_s13 = sphi %s765_s13, %s1036_s13   ;;  %s712_s12 = sphi %s763_s12, %s1035_s12  }
   0x8   : > { %p54_p0 = scmp.ne.s32.totalorder %s716_s13, %s712_s12  ;;  %p797_p1 = scmp.eq.s32.totalorder %s431_s18, 0 }
   0x9   : > { %p801_p2 = scmp.eq.s32.totalorder %s431_s18, 1  ;;  %p128_p3 = scmp.eq.s32.totalorder %s432_s19, 1 }
   0xa   : > { %s1022_s20 = scalar_select %p797_p1, 1, 0 }
   0xb   : > { %p807_p4 = por %p797_p1, %p54_p0  ;;  %p433_p5 = scmp.ge.s32.totalorder %s732_s17, 1 }
   0xc   : > { %p812_p6 = por %p128_p3, %p54_p0  ;;  %p135_p7 = scmp.lt.s32.totalorder %s732_s17, 3 }
   0xd   : > { %s1024_s22 = scalar_select %p807_p4, 1, 0 }
   0xe   : > { %s1025_s23 = scalar_select %p812_p6, 1, 0 }
   0xf   : > { %p817_p8 = pnand %p433_p5, %p135_p7  ;;  %s734_s25 = smov [#allocation5]  }
  0x10   : > { %s147_s26 = sshll.u32 %s734_s25, 4  ;;  %s735_s28 = smov [#allocation7]   ;;  %s821_s26 = int_to_ptr.vmem [resolvable:$true] %s147_s26 }
  0x11   : > { %p484_p9 = pneg %p817_p8  ;;  %s161_s29 = sshll.u32 %s735_s28, 4  ;;  %s832_s29 = int_to_ptr.vmem [resolvable:$true] %s161_s29 }
  0x12   : > { %s560_s5 = scalar_lea.hbm %s1015_s1, 512 }
  0x13   : > { %p828_p11 = pnand %p484_p9, %p797_p1  ;;  %p561_p12 = scmp.ne.s32.totalorder %s1015_s1, %s560_s5 }
  0x14   : > { %p567_p5 = scmp.lt.u32.totalorder %s560_s5, %s1015_s1 }
  0x15   : > { %p562_p13 = pneg %p828_p11 }
  0x17   : > { %p563_p0 = pnand %p562_p13, %p561_p12 }
  0x19   : > { %p564_p3 = pneg %p563_p0 }
  0x1b   : > { %p569_p7 = pnand %p567_p5, %p564_p3 }
  0x1d   : > { %572 = shalt.err (!%p569_p7)
}
  0x1e   : > { %s573_s10 = scalar_lea.vmem %s821_s26, 512  ;;  %p581_p1 = scmp.lt.s32.totalorder %s821_s26, %s821_s26 }
  0x1f   : > { %p574_p9 = scmp.ne.s32.totalorder %s821_s26, %s573_s10  ;;  %p582_p12 = scmp.lt.s32.totalorder %s573_s10, %s573_s10 }
  0x21   : > { %p576_p10 = pnand %p574_p9, %p562_p13  ;;  %p583_p0 = por %p582_p12, %p581_p1 }
  0x23   : > { %p577_p6 = pneg %p576_p10 }
  0x25   : > { %p584_p4 = pnand %p583_p0, %p577_p6 }
  0x27   : > { %587 = shalt.err (!%p584_p4)
}
  0x28   : > { %s736_s11 = smov 128   ;;  %s737_s18 = smov 8  }
  0x29   : > { %487 = dma.hbm_to_vmem [thread:$0]  (!%p828_p11), %s1015_s1, 512, %s821_s26, [#allocation6], %s736_s11, %s736_s11, %s737_s18  }
  0x2a   : > { %s588_s4 = scalar_lea.hbm %s1016_s2, 16 }
  0x2b   : > { %p589_p1 = scmp.ne.s32.totalorder %s1016_s2, %s588_s4  ;;  %p595_p10 = scmp.lt.u32.totalorder %s588_s4, %s1016_s2 }
  0x2d   : > { %p591_p4 = pnand %p589_p1, %p562_p13 }
  0x2f   : > { %p592_p6 = pneg %p591_p4 }
  0x31   : > { %p597_p3 = pnand %p595_p10, %p592_p6 }
  0x33   : > { %600 = shalt.err (!%p597_p3)
}
  0x34   : > { %s601_s26 = scalar_lea.vmem %s832_s29, 16  ;;  %s608_s9 = scalar_lea.vmem %s832_s29, 32 }
  0x35   : > { %p602_p5 = scmp.ne.s32.totalorder %s832_s29, %s601_s26  ;;  %p609_p12 = scmp.lt.s32.totalorder %s832_s29, %s832_s29 }
  0x36   : > { %p610_p0 = scmp.lt.s32.totalorder %s608_s9, %s601_s26 }
  0x37   : > { %p604_p7 = pnand %p602_p5, %p562_p13 }
  0x38   : > { %p611_p1 = por %p610_p0, %p609_p12 }
  0x39   : > { %p605_p9 = pneg %p604_p7 }
  0x3b   : > { %p612_p4 = pnand %p611_p1, %p605_p9 }
  0x3d   : > { %615 = shalt.err (!%p612_p4)
}
  0x3e   : > { %490 = dma.hbm_to_vmem [thread:$0]  (!%p828_p11), %s1016_s2, 16, %s832_s29, [#allocation6]  }
  0x3f   : > { %s32_s18 = sadd.s32 1, %s728_s16  ;;  %s41_s19 = sadd.s32 1, %s720_s14 }
  0x40   : > { %p34_p13 = scmp.ge.s32.totalorder %s32_s18, 2  ;;  %p48_p6 = scmp.ne.s32.totalorder %s720_s14, %s716_s13 }
  0x41   : > { %p49_p10 = scmp.eq.s32.totalorder %s732_s17, 0  ;;  %p501_p3 = scmp.lt.s32.totalorder %s732_s17, 2 }
  0x42   : > { %s1041_s18 = smov (%p34_p13, %s32_s18), 0  ;;  %p897_p7 = por %p801_p2, %p48_p6 }
  0x43   : > { %p50_p5 = por %p49_p10, %p48_p6  ;;  %s36_s25 = ssub.s32 %s728_s16, %s1041_s18 }
  0x44   : > { %s1028_s27 = scalar_select %p897_p7, 1, 0 }
  0x45   : > { %s172_s28 = sand.u32 1, %s720_s14   ;;  %p39_p9 = scmp.eq.s32.totalorder %s36_s25, 0 }
  0x46   : > { %s437_s29 = sshll.u32 %s172_s28, 3  ;;  %s438_s30 = sshll.u32 %s728_s16, 7 }
  0x47   : > { %s906_s4 = scalar_select %p39_p9, %s720_s14, %s41_s19  }
  0x48   : > { %s911_s7 = scalar_lea.hbm %s1014_s0, %s438_s30  ;;  %s176_s21 = scalar_lea.vmem [#allocation2], %s437_s29 }
  0x49   : > { %s184_s8 = sshll.u32 %s176_s21, 4  ;;  %p915_p2 = pnand %p501_p3, %p50_p5  ;;  %s919_s8 = int_to_ptr.vmem [resolvable:$true] %s184_s8 }
  0x4a   : > { %s173_s9 = scalar_lea.sflag [#allocation3], %s172_s28  ;;  %s616_s10 = scalar_lea.hbm %s911_s7, 128 }
  0x4b   : > { %p617_p11 = scmp.ne.s32.totalorder %s911_s7, %s616_s10  ;;  %p618_p12 = pneg %p915_p2 }
  0x4c   : > { %s621_s25 = scalar_lea.hbm %s1014_s0, 256  ;;  %p622_p4 = scmp.lt.u32.totalorder %s911_s7, %s1014_s0 }
  0x4d   : > { %p619_p0 = pnand %p618_p12, %p617_p11  ;;  %p623_p13 = scmp.lt.u32.totalorder %s621_s25, %s616_s10 }
  0x4e   : > { %p625_p10 = scmp.lt.u32.totalorder %s616_s10, %s911_s7 }
  0x4f   : > { %p620_p1 = pneg %p619_p0  ;;  %p624_p6 = por %p623_p13, %p622_p4 }
  0x51   : > { %p626_p3 = por %p625_p10, %p624_p6 }
  0x53   : > { %p627_p5 = pnand %p626_p3, %p620_p1 }
  0x55   : > { %630 = shalt.err (!%p627_p5)
}
  0x56   : > { %s631_s28 = scalar_lea.vmem %s919_s8, 128  ;;  %s738_s5 = smov [#allocation2]  }
  0x57   : > { %p632_p9 = scmp.ne.s32.totalorder %s919_s8, %s631_s28  ;;  %s636_s6 = sshll.u32 %s738_s5, 4  ;;  %s637_s6 = int_to_ptr.vmem [resolvable:$false] %s636_s6 }
  0x58   : > { %s638_s21 = scalar_lea.vmem %s637_s6, 256  ;;  %p639_p7 = scmp.lt.s32.totalorder %s919_s8, %s637_s6 }
  0x59   : > { %p634_p11 = pnand %p632_p9, %p618_p12  ;;  %p640_p4 = scmp.lt.s32.totalorder %s638_s21, %s631_s28 }
  0x5b   : > { %p635_p0 = pneg %p634_p11  ;;  %p641_p13 = por %p640_p4, %p639_p7 }
  0x5d   : > { %p642_p6 = pnand %p641_p13, %p635_p0 }
  0x5f   : > { %645 = shalt.err (!%p642_p6)
}
  0x60   : > { %494 = dma.hbm_to_vmem [thread:$0]  (!%p915_p2), %s911_s7, 128, %s919_s8, %s173_s9  }
  0x61   : > { %193 = sbr.rel (%p817_p8) target bundleno = 347 (0x15b), region = 32  ;;  %s949_s10 = sand.u32 (!%p817_p8), 1, %s716_s13  }
  0x62   : > { %s440_s11 = sshll.u32 (!%p817_p8), %s949_s10, 3  ;;  %s196_s19 = scalar_lea.sflag (!%p817_p8), [#allocation3], %s949_s10 }
  0x63   : > { %s199_s25 = scalar_lea.vmem (!%p817_p8), [#allocation2], %s440_s11  ;;  %p1030_p7 = scmp.ne.s32.totalorder (!%p817_p8), %s1024_s22, 0 }
  0x68   : > { %699 = dma.done.wait (%p1030_p7), %s196_s19, 128  }
  0x69   : > { %701 = vsyncadd (%p1030_p7), %s196_s19, 4294967168  ;;  %p1031_p12 = scmp.ne.s32.totalorder %s1022_s20, 0 }
  0x6b   : > { %703 = dma.done.wait (%p1031_p12), [#allocation6], 528  }
  0x6c   : > { %705 = vsyncadd (%p1031_p12), [#allocation6], 4294966768  ;;  %v739_v0 = vmov 0.0|0.0   ;;  %vm740_vm0 = vmmov 0   ;;  %v741_v1 = vmov 0.0   ;;  %v231_v2 = vld [vmem:[#allocation5] sm:$0xff] }
  0x6d   : > { %466 = vmatprep.subr.bf16.mxu0 %v739_v0  ;;  %463 = vmatprep.mubr.msk.f32.mxu0 %vm740_vm0, %v741_v1  ;;  %v232_v3 = vld [vmem:[#allocation5 + $0x8] sm:$0xff]  ;;  %v233_v4 = vld [vmem:[#allocation5 + $0x10] sm:$0xff]  ;;  %v234_v6 = vld [vmem:[#allocation5 + $0x18] sm:$0xff]  ;;  %vm242_vm1 = vcmask 261120   ;;  %s447_s20 = sshll.u32 %s724_s15, 7  ;;  %s229_s22 = scalar_lea.vmem [#allocation8], %s440_s11 }
  0x6e   : > { %v467_v5 = vpack.c.bf16 %v232_v3, %v231_v2  ;;  %v470_v7 = vpack.c.bf16 %v234_v6, %v233_v4  ;;  %v230_v8 = vld [vmem:[%s199_s25] sm:$0xff]  ;;  %v444_v9 = vld [vmem:[#allocation7] ss:$0 sm:$0xff]  ;;  %s332_s24 = sshll.u32 %s229_s22, 4  ;;  %s965_s26 = scalar_lea.hbm %s1017_s3, %s447_s20  ;;  %s967_s24 = int_to_ptr.vmem [resolvable:$true] %s332_s24 }
  0x6f   : > { %s318_s9 = scalar_lea.sflag [#allocation4], %s949_s10  ;;  %s646_s29 = scalar_lea.vmem %s967_s24, 128 }
  0x70   : > { %468 = vmatpush3.bf16.msra.mxu0 %v467_v5  ;;  %p647_p8 = scmp.ne.s32.totalorder %s967_s24, %s646_s29  ;;  %p1032_p2 = scmp.ne.s32.totalorder %s1028_s27, 0 }
  0x71   : > { %469 = vmatprep.subr.bf16.mxu0 %v739_v0  ;;  %s742_s15 = smov [#allocation8]  }
  0x72   : > { %p648_p1 = pnand %p647_p8, %p1032_p2  ;;  %s650_s30 = sshll.u32 %s742_s15, 4  ;;  %s651_s30 = int_to_ptr.vmem [resolvable:$false] %s650_s30 }
  0x73   : > { %s652_s28 = scalar_lea.vmem %s651_s30, 256  ;;  %p653_p3 = scmp.lt.s32.totalorder %s967_s24, %s651_s30 }
  0x74   : > { %471 = vmatpush3.bf16.msra.mxu0 %v470_v7  ;;  %p649_p10 = pneg %p648_p1  ;;  %p654_p5 = scmp.lt.s32.totalorder %s652_s28, %s646_s29 }
  0x76   : > { %p655_p9 = por %p654_p5, %p653_p3 }
  0x77   : > { %464 = vmatmul.mubr.msk.f32.vlgmr.msra.gmra.mrb[0].mxu0 %vm242_vm1, %v230_v8 }
  0x78   : > { %p656_p11 = pnand %p655_p9, %p649_p10 }
 0x14a   : > { %v312_v10 = vpop.f32.mrb[0].mxu0 }
 0x14b   : > { %v313_v11 = vadd.f32 %v444_v9, %v312_v10  ;;  %v465_v12 = vpop.f32.mrb[1].mxu0 }
 0x14d   : > { %316 = vst.msk [vmem:[%s229_s22] sm:$0xff] %vm242_vm1, %v313_v11 }
 0x14e   : > { %659 = shalt.err (!%p656_p11)
}
 0x14f   : > { %s660_s5 = scalar_lea.hbm %s965_s26, 128  ;;  %s664_s10 = scalar_lea.hbm %s1017_s3, 256 }
 0x150   : > { %p661_p0 = scmp.ne.s32.totalorder %s965_s26, %s660_s5  ;;  %p665_p6 = scmp.lt.u32.totalorder %s965_s26, %s1017_s3 }
 0x151   : > { %p666_p7 = scmp.lt.u32.totalorder %s664_s10, %s660_s5  ;;  %p668_p8 = scmp.lt.u32.totalorder %s660_s5, %s965_s26 }
 0x152   : > { %p662_p4 = pnand %p661_p0, %p1032_p2 }
 0x153   : > { %p667_p12 = por %p666_p7, %p665_p6 }
 0x154   : > { %p663_p13 = pneg %p662_p4 }
 0x155   : > { %p669_p1 = por %p668_p8, %p667_p12 }
 0x157   : > { %p670_p10 = pnand %p669_p1, %p663_p13 }
 0x159   : > { %673 = shalt.err (!%p670_p10)
}
 0x15a   : > { %482 = dma.vmem_to_hbm [thread:$0]  (%p1032_p2), %s967_s24, 128, %s965_s26, %s318_s9  }
 0x15b PF: > { %s344_s25 = sand.u32 1, %s712_s12   ;;  %p1033_p3 = scmp.ne.s32.totalorder %s1025_s23, 0 }
 0x15c   : > { %p1034_p5 = scmp.ge.s32.totalorder %s732_s17, 2  ;;  %s345_s20 = scalar_lea.sflag [#allocation4], %s344_s25 }
 0x15e   : > { %p496_p9 = pnand %p1034_p5, %p1033_p3 }
 0x160   : > { %707 = dma.done.wait (!%p496_p9), %s345_s20, 128  }
 0x161   : > { %709 = vsyncadd (!%p496_p9), %s345_s20, 4294967168  ;;  %s20_s17 = sadd.s32 1, %s732_s17   ;;  %s1035_s12 = smov %s716_s13 }
 0x162   : > { %p17_p11 = scmp.ge.s32.totalorder %s20_s17, 4   ;;  %s1036_s13 = smov %s720_s14 }
 0x163   : > { %s1037_s14 = smov %s906_s4  ;;  %s1038_s15 = smov %s728_s16 }
 0x164   : > { %s1039_s16 = smov %s1041_s18  ;;  %19 = sbr.rel (!%p17_p11) target bundleno = 7 (0x7), region = 85 }
 0x16b   :  { %350 = vsyncpa [#allocation3], 1 }
 0x16c   :  { %352 = vsyncpa [#allocation3 + $0x1], 1 }
 0x16d   :  { %353 = vsyncpa [#allocation6], 1 }
 0x16e   :  { %354 = vsyncpa [#allocation4], 1 }
 0x16f   :  { %356 = vsyncpa [#allocation4 + $0x1], 1 }

</bundles_post_ra>
